<compile_context>
chip_gen: v5e
topology: v5e:2x2
jax: 0.10.0
libtpu: 0.0.40
codegen_flags: <defaults>
</compile_context>

<pallas_src>
import functools

import jax
import jax.numpy as jnp
from jax.experimental import pallas as pl
from jax.experimental.pallas import tpu as pltpu

EPS = 1e-6


def _round_up(x, m):
    return ((x + m - 1) // m) * m


def _vmem_capacity_bytes():
    try:
        return int(pltpu.get_tpu_info().vmem_capacity_bytes)
    except Exception:
        return 64 * 1024 * 1024          # conservative fallback: v7x per-TC VMEM


def _vmem_budget_and_limit():
    cap = _vmem_capacity_bytes()
    if cap >= 128 * 1024 * 1024:         # v5e / v6e: 128 MiB physical VMEM
        return 48 * 1024 * 1024, 96 * 1024 * 1024
    return 20 * 1024 * 1024, 48 * 1024 * 1024   # v7x: 64 MiB per TensorCore


# ---------------------------------------------------------------------------
# Kernel 1: token pooling (mean over patch tokens, skipping the CLS token)
# ---------------------------------------------------------------------------
def _pool_kernel(feat_ref, pooled_ref):
    feats = feat_ref[...]                                   # [TB, T, D] (bf16)
    n_patches = feats.shape[1] - 1
    # mean over tokens 1..T-1 == (sum over all tokens - CLS token) / (T-1)
    # f32-accumulating reduce; avoids the sublane-unaligned [:, 1:, :] slice.
    total = jnp.sum(feats, axis=1, dtype=jnp.float32)       # [TB, D] f32
    cls = feats[:, 0, :].astype(jnp.float32)
    pooled_ref[...] = ((total - cls) * (1.0 / n_patches)).astype(pooled_ref.dtype)


# ---------------------------------------------------------------------------
# Kernel 2: BatchNorm normalize (stats passed in) + Linear head (bf16 MXU)
# ---------------------------------------------------------------------------
def _head_kernel(pooled_ref, mu_ref, rstd_ref, w_ref, b_ref, out_ref):
    normed = (pooled_ref[...] - mu_ref[...]) * rstd_ref[...]        # [TBH, D] f32
    logits = jnp.dot(normed.astype(jnp.bfloat16), w_ref[...],       # bf16 MXU
                     preferred_element_type=jnp.float32)
    out_ref[...] = (logits + b_ref[...]).astype(out_ref.dtype)      # lane-dense


def _choose_batch_tile(B, T, D, feat_itemsize, budget_bytes):
    """Batch tile so double-buffered input/output + f32 reduce temp fit budget."""
    per_row = (2 * T * D * feat_itemsize    # double-buffered bf16 input tile
               + T * D * 4                  # possible f32 temp of the reduce
               + 2 * D * 4)                 # double-buffered f32 pooled output
    tb = budget_bytes // max(per_row, 1)
    if B >= 16:
        # guarantee grid >= 2 so "parallel" semantics can engage both v7x
        # TensorCores (one extra ~0.35us grid step elsewhere: negligible)
        tb = min(tb, _round_up(pl.cdiv(B, 2), 8))
    tb = max(1, min(tb, B))
    if tb >= 8:
        tb = (tb // 8) * 8                  # sublane-aligned
    return tb


def _choose_head_tiles(B, D, c_pad):
    tbh = B if B <= 512 else 256            # == B (full) or multiple of 8
    tn = c_pad if c_pad <= 2048 else 1024   # lane-dense multiples of 128
    return tbh, tn


def prepare_head_params(w, b, num_classes):
    """Pad class dim to a multiple of 128 once, outside the jitted forward.

    w: [D, C] -> bf16 [D, c_pad] (MXU-native); b: [C] or [1, C] -> f32 [1, c_pad].
    """
    D = w.shape[0]
    c_pad = _round_up(num_classes, 128)
    w_pad = jnp.zeros((D, c_pad), jnp.bfloat16).at[:, :num_classes].set(
        w.astype(jnp.bfloat16))
    b_pad = jnp.zeros((1, c_pad), jnp.float32).at[:, :num_classes].set(
        b.astype(jnp.float32).reshape(1, -1))
    return w_pad, b_pad


@functools.partial(jax.jit, static_argnames=("num_classes", "batch_tile"))
def linear_probe_head(features, w_pad, b_pad, *, num_classes, batch_tile=None):
    """features: [B, T, D] ViT token features (bf16 ok); w_pad: bf16 [D, c_pad];
    b_pad: f32 [1, c_pad].  Returns (logits [B, C] f32, pooled [B, D] f32)."""
    B, T, D = features.shape
    feat_itemsize = features.dtype.itemsize
    c_pad = w_pad.shape[1]

    budget, vmem_limit = _vmem_budget_and_limit()

    # --- kernel 1: pooling, tiled + pipelined over the batch ------------------
    tb = batch_tile if batch_tile is not None else _choose_batch_tile(
        B, T, D, feat_itemsize, budget)
    tb = max(1, min(tb, B))
    grid_b = pl.cdiv(B, tb)

    pool_cost = pl.CostEstimate(
        flops=B * T * D,
        transcendentals=0,
        bytes_accessed=B * T * D * feat_itemsize + B * D * 4,
    )
    pooled = pl.pallas_call(
        _pool_kernel,
        out_shape=jax.ShapeDtypeStruct((B, D), jnp.float32),
        grid_spec=pltpu.PrefetchScalarGridSpec(
            num_scalar_prefetch=0,
            grid=(grid_b,),
            in_specs=[pl.BlockSpec((tb, T, D), lambda i: (i, 0, 0))],
            out_specs=pl.BlockSpec((tb, D), lambda i: (i, 0)),
        ),
        compiler_params=pltpu.CompilerParams(
            dimension_semantics=("parallel",),     # v7x: both TensorCores
            vmem_limit_bytes=vmem_limit,
        ),
        cost_estimate=pool_cost,
    )(features)

    # --- BatchNorm1d(affine=False) batch statistics: tiny XLA op on [B, D] ----
    mu = jnp.mean(pooled, axis=0, keepdims=True)                       # [1, D]
    var = jnp.mean(jnp.square(pooled - mu), axis=0, keepdims=True)     # biased
    rstd = jax.lax.rsqrt(var + EPS)                                    # [1, D]

    # --- kernel 2: normalize + linear head, tiled over batch and classes ------
    tbh, tn = _choose_head_tiles(B, D, c_pad)
    head_cost = pl.CostEstimate(
        flops=2 * B * D * c_pad + 4 * B * D,
        transcendentals=0,
        bytes_accessed=B * D * 4 + D * c_pad * 2 + B * c_pad * 4 + 2 * D * 4,
    )
    logits_pad = pl.pallas_call(
        _head_kernel,
        out_shape=jax.ShapeDtypeStruct((B, c_pad), jnp.float32),
        grid_spec=pltpu.PrefetchScalarGridSpec(
            num_scalar_prefetch=0,
            grid=(pl.cdiv(B, tbh), pl.cdiv(c_pad, tn)),
            in_specs=[
                pl.BlockSpec((tbh, D), lambda i, j: (i, 0)),   # pooled (batch tile)
                pl.BlockSpec((1, D), lambda i, j: (0, 0)),     # mu
                pl.BlockSpec((1, D), lambda i, j: (0, 0)),     # rstd
                pl.BlockSpec((D, tn), lambda i, j: (0, j)),    # weights (class tile)
                pl.BlockSpec((1, tn), lambda i, j: (0, j)),    # bias
            ],
            out_specs=pl.BlockSpec((tbh, tn), lambda i, j: (i, j)),
        ),
        compiler_params=pltpu.CompilerParams(
            dimension_semantics=("parallel", "parallel"),
            vmem_limit_bytes=48 * 1024 * 1024,
        ),
        cost_estimate=head_cost,
    )(pooled, mu, rstd, w_pad, b_pad)

    return logits_pad[:, :num_classes], pooled


def stub_backbone_features(x, patch_w, cls_token, patch=4):
    """Deterministic stand-in for the frozen pretrained ViT/MAE backbone (plain JAX glue).

    x: [B, C, H, W] (NCHW, as in PyTorch) -> bf16 token features [B, 1+N, D].
    """
    # TODO(synk): real pretrained backbone forward is external to this module; stubbed.
    B, C, H, W = x.shape
    gh, gw = H // patch, W // patch
    xp = x.reshape(B, C, gh, patch, gw, patch)
    xp = jnp.transpose(xp, (0, 2, 4, 1, 3, 5)).reshape(B, gh * gw, C * patch * patch)
    tokens = jnp.tanh(xp @ patch_w)                          # [B, N, D]
    cls = jnp.broadcast_to(cls_token, (B, 1, tokens.shape[-1]))
    feats = jnp.concatenate([cls, tokens], axis=1)           # [B, 1+N, D]
    return feats.astype(jnp.bfloat16)                        # memory-bound path: bf16


if __name__ == "__main__":
    # Small shapes: batch=16, channels=4, spatial=16x16, patch=4 -> 17 tokens, dim=32, classes=4
    B, C, H, W = 16, 4, 16, 16
    PATCH = 4
    DIM = 32
    NUM_CLASSES = 4

    key = jax.random.PRNGKey(0)
    k_x, k_pw, k_cls, k_w, k_b = jax.random.split(key, 5)

    x = jax.random.normal(k_x, (B, C, H, W), dtype=jnp.float32)

    # Deterministic "backbone" params (stub patch embedding + CLS token)
    patch_w = 0.05 * jax.random.normal(k_pw, (C * PATCH * PATCH, DIM), jnp.float32)
    cls_token = 0.02 * jax.random.normal(k_cls, (1, 1, DIM), jnp.float32)

    # Classification head params: Linear(DIM -> NUM_CLASSES), stored as [D, C] + [1, C]
    head_w = 0.02 * jax.random.normal(k_w, (DIM, NUM_CLASSES), jnp.float32)
    head_b = 0.01 * jax.random.normal(k_b, (1, NUM_CLASSES), jnp.float32)

    features = stub_backbone_features(x, patch_w, cls_token, patch=PATCH)  # [B, 17, 32] bf16

    # Pre-pad / pre-cast head params once (outside the per-call jitted path).
    w_pad, b_pad = prepare_head_params(head_w, head_b, NUM_CLASSES)

    # batch_tile=8 -> grid=(2,) exercises the batch-tiled, pipelined pooling kernel.
    logits, pooled = linear_probe_head(features, w_pad, b_pad,
                                       num_classes=NUM_CLASSES, batch_tile=8)
    jax.block_until_ready((logits, pooled))

    # Pure-JAX reference (same bf16 features, f32 accumulation)
    feats32 = features.astype(jnp.float32)
    pooled_ref = jnp.mean(feats32[:, 1:, :], axis=1)
    mu = jnp.mean(pooled_ref, axis=0, keepdims=True)
    var = jnp.mean((pooled_ref - mu) ** 2, axis=0, keepdims=True)
    normed_ref = (pooled_ref - mu) * jax.lax.rsqrt(var + EPS)
    # mirror of the kernel's bf16-operand / f32-accumulation matmul
    logits_ref_bf16 = (normed_ref.astype(jnp.bfloat16).astype(jnp.float32)
                       @ head_w.astype(jnp.bfloat16).astype(jnp.float32)) + head_b
    # full-f32 semantic reference (looser tolerance)
    logits_ref_f32 = normed_ref @ head_w + head_b

    assert logits.shape == (B, NUM_CLASSES) and pooled.shape == (B, DIM)
    assert jnp.allclose(pooled, pooled_ref, atol=1e-4, rtol=1e-4)
    assert jnp.allclose(logits, logits_ref_bf16, atol=2e-3, rtol=2e-3)
    assert jnp.allclose(logits, logits_ref_f32, atol=2e-2, rtol=2e-2)
    print("KERNEL_OK")
</pallas_src>

<mosaic_0001>
module attributes {stable_mosaic.version = 11 : i64} {
  func.func @_pool_kernel(%arg0: i32, %arg1: memref<8x17x32xbf16, #tpu.memory_space<vmem>>, %arg2: memref<8x32xf32, #tpu.memory_space<vmem>>) attributes {dimension_semantics = [#tpu.dimension_semantics<parallel>], iteration_bounds = array<i64: 2>, scalar_prefetch = 0 : i64, scratch_operands = 0 : i64, tpu.core_type = #tpu.core_type<tc>, window_params = [{transform_indices = @transform_0, window_bounds = array<i64: 8, 17, 32>}, {transform_indices = @transform_1, window_bounds = array<i64: 8, 32>}]} {
    %c0 = arith.constant 0 : index
    %c0_0 = arith.constant 0 : index
    %c0_1 = arith.constant 0 : index
    %0 = vector.load %arg1[%c0, %c0_0, %c0_1] : memref<8x17x32xbf16, #tpu.memory_space<vmem>>, vector<8x17x32xbf16>
    %1 = arith.extf %0 : vector<8x17x32xbf16> to vector<8x17x32xf32>
    %cst = arith.constant dense<0.000000e+00> : vector<8x32xf32>
    %2 = vector.multi_reduction <add>, %1, %cst [1] : vector<8x17x32xf32> to vector<8x32xf32>
    %3 = vector.extract_strided_slice %0 {offsets = [0, 0, 0], sizes = [8, 1, 32], strides = [1, 1, 1]} : vector<8x17x32xbf16> to vector<8x1x32xbf16>
    %4 = vector.shape_cast %3 : vector<8x1x32xbf16> to vector<8x32xbf16>
    %5 = arith.extf %4 : vector<8x32xbf16> to vector<8x32xf32>
    %6 = arith.subf %2, %5 : vector<8x32xf32>
    %cst_2 = arith.constant 6.250000e-02 : f32
    %7 = vector.broadcast %cst_2 : f32 to vector<8x32xf32>
    %8 = arith.mulf %6, %7 : vector<8x32xf32>
    %c0_3 = arith.constant 0 : index
    %c0_4 = arith.constant 0 : index
    %9 = vector.load %arg2[%c0_3, %c0_4] : memref<8x32xf32, #tpu.memory_space<vmem>>, vector<8x32xf32>
    tpu.vector_store %arg2[%c0_3, %c0_4], %8 {strides = array<i32>} : memref<8x32xf32, #tpu.memory_space<vmem>>, vector<8x32xf32>,
    return
  }
  func.func @transform_0(%arg0: i32) -> (i32, i32, i32) {
    %c0_i32 = arith.constant 0 : i32
    %c0_i32_0 = arith.constant 0 : i32
    %c0_i32_1 = arith.constant 0 : i32
    return %arg0, %c0_i32, %c0_i32_0 : i32, i32, i32
  }
  func.func @transform_1(%arg0: i32) -> (i32, i32) {
    %c0_i32 = arith.constant 0 : i32
    %c0_i32_0 = arith.constant 0 : i32
    return %arg0, %c0_i32 : i32, i32
  }
}

module attributes {stable_mosaic.version = 11 : i64} {
  func.func @_head_kernel(%arg0: i32, %arg1: i32, %arg2: memref<16x32xf32, #tpu.memory_space<vmem>>, %arg3: memref<1x32xf32, #tpu.memory_space<vmem>>, %arg4: memref<1x32xf32, #tpu.memory_space<vmem>>, %arg5: memref<32x128xbf16, #tpu.memory_space<vmem>>, %arg6: memref<1x128xf32, #tpu.memory_space<vmem>>, %arg7: memref<16x128xf32, #tpu.memory_space<vmem>>) attributes {dimension_semantics = [#tpu.dimension_semantics<parallel>, #tpu.dimension_semantics<parallel>], iteration_bounds = array<i64: 1, 1>, scalar_prefetch = 0 : i64, scratch_operands = 0 : i64, tpu.core_type = #tpu.core_type<tc>, window_params = [{transform_indices = @transform_0, window_bounds = array<i64: 16, 32>}, {pipeline_mode = #tpu.pipeline_mode<synchronous>, transform_indices = @transform_1, window_bounds = array<i64: 1, 32>}, {pipeline_mode = #tpu.pipeline_mode<synchronous>, transform_indices = @transform_2, window_bounds = array<i64: 1, 32>}, {transform_indices = @transform_3, window_bounds = array<i64: 32, 128>}, {transform_indices = @transform_4, window_bounds = array<i64: 1, 128>}, {transform_indices = @transform_5, window_bounds = array<i64: 16, 128>}]} {
    %c0 = arith.constant 0 : index
    %c0_0 = arith.constant 0 : index
    %0 = vector.load %arg2[%c0, %c0_0] : memref<16x32xf32, #tpu.memory_space<vmem>>, vector<16x32xf32>
    %c0_1 = arith.constant 0 : index
    %c0_2 = arith.constant 0 : index
    %1 = vector.load %arg3[%c0_1, %c0_2] : memref<1x32xf32, #tpu.memory_space<vmem>>, vector<1x32xf32>
    %2 = vector.broadcast %1 : vector<1x32xf32> to vector<16x32xf32>
    %3 = arith.subf %0, %2 : vector<16x32xf32>
    %c0_3 = arith.constant 0 : index
    %c0_4 = arith.constant 0 : index
    %4 = vector.load %arg4[%c0_3, %c0_4] : memref<1x32xf32, #tpu.memory_space<vmem>>, vector<1x32xf32>
    %5 = vector.broadcast %4 : vector<1x32xf32> to vector<16x32xf32>
    %6 = arith.mulf %3, %5 : vector<16x32xf32>
    %7 = arith.truncf %6 : vector<16x32xf32> to vector<16x32xbf16>
    %c0_5 = arith.constant 0 : index
    %c0_6 = arith.constant 0 : index
    %8 = vector.load %arg5[%c0_5, %c0_6] : memref<32x128xbf16, #tpu.memory_space<vmem>>, vector<32x128xbf16>
    %cst = arith.constant dense<0.000000e+00> : vector<16x128xf32>
    %9 = tpu.matmul %7, %8, %cst {dimension_numbers = #tpu.dot_dimension_numbers<[1], [0], [0], [1], [0, 0, 1, 1], [], []>} : vector<16x32xbf16>, vector<32x128xbf16>, vector<16x128xf32> -> vector<16x128xf32>
    %c0_7 = arith.constant 0 : index
    %c0_8 = arith.constant 0 : index
    %10 = vector.load %arg6[%c0_7, %c0_8] : memref<1x128xf32, #tpu.memory_space<vmem>>, vector<1x128xf32>
    %11 = vector.broadcast %10 : vector<1x128xf32> to vector<16x128xf32>
    %12 = arith.addf %9, %11 : vector<16x128xf32>
    %c0_9 = arith.constant 0 : index
    %c0_10 = arith.constant 0 : index
    %13 = vector.load %arg7[%c0_9, %c0_10] : memref<16x128xf32, #tpu.memory_space<vmem>>, vector<16x128xf32>
    tpu.vector_store %arg7[%c0_9, %c0_10], %12 {strides = array<i32>} : memref<16x128xf32, #tpu.memory_space<vmem>>, vector<16x128xf32>,
    return
  }
  func.func @transform_0(%arg0: i32, %arg1: i32) -> (i32, i32) {
    %c0_i32 = arith.constant 0 : i32
    %c0_i32_0 = arith.constant 0 : i32
    return %arg0, %c0_i32 : i32, i32
  }
  func.func @transform_1(%arg0: i32, %arg1: i32) -> (i32, i32) {
    %c0_i32 = arith.constant 0 : i32
    %c0_i32_0 = arith.constant 0 : i32
    %c0_i32_1 = arith.constant 0 : i32
    return %c0_i32, %c0_i32_0 : i32, i32
  }
  func.func @transform_2(%arg0: i32, %arg1: i32) -> (i32, i32) {
    %c0_i32 = arith.constant 0 : i32
    %c0_i32_0 = arith.constant 0 : i32
    %c0_i32_1 = arith.constant 0 : i32
    return %c0_i32, %c0_i32_0 : i32, i32
  }
  func.func @transform_3(%arg0: i32, %arg1: i32) -> (i32, i32) {
    %c0_i32 = arith.constant 0 : i32
    %c0_i32_0 = arith.constant 0 : i32
    return %c0_i32, %arg1 : i32, i32
  }
  func.func @transform_4(%arg0: i32, %arg1: i32) -> (i32, i32) {
    %c0_i32 = arith.constant 0 : i32
    %c0_i32_0 = arith.constant 0 : i32
    return %c0_i32, %arg1 : i32, i32
  }
  func.func @transform_5(%arg0: i32, %arg1: i32) -> (i32, i32) {
    %c0_i32 = arith.constant 0 : i32
    return %arg0, %arg1 : i32, i32
  }
}

</mosaic_0001>

<bundles_post_ra>
// kernel: linear_probe_head.2
= control target key start
LH: loop header
LB: loop body
LE: loop exit
PB: predicated region body
PF: predicated region fallthrough
CT: control target
= control target key end

     0   :  { %s414_s6 = smov 0   ;;  %s548_s0 = inlined_call_operand.vmem [shape: bf16[16,17,32], index: 0, kind: input, shape index: {}]   ;;  %s549_s1 = inlined_call_operand.vmem [shape: f32[16,32], index: 1, kind: output, shape index: {}]  }
   0x1 LB: > { %s420_s7 = sadd.s32 4294967295, %s402_s6   ;;  %p362_p0 = scmp.ge.s32.totalorder %s402_s6, 1  ;;  %s402_s6 = sphi %s414_s6, %s11_s6  }
   0x2   : > { %p89_p1 = scmp.lt.s32.totalorder %s402_s6, 3 }
   0x4   : > { %p90_p2 = pnand %p362_p0, %p89_p1 }
   0x5   : > { %s363_s8 = sshll.u32 (!%p90_p2), %s420_s7, 3  ;;  %p116_p4 = scmp.lt.s32.totalorder (!%p90_p2), %s420_s7, 1 }
   0x6   : > { %93 = sbr.rel (%p90_p2) target bundleno = 62 (0x3e), region = 24  ;;  %p110_p3 = scmp.lt.s32.totalorder (!%p90_p2), %s363_s8, 15 }
   0xb   : > { %s551_s8 = smov (!%p110_p3, %s363_s8), 15  ;;  %vm168_vm0 = vcmask 261120   ;;  %vm172_vm1 = vcmask 253952   ;;  %vm283_vm2 = vcmask 1041409   ;;  %vm286_vm3 = vcmask 1042434   ;;  %s553_s7 = smov (!%p116_p4, %s420_s7), 1 }
   0xc   : > { %s387_s9 = smul.u32 12, %s551_s8  ;;  %vm289_vm4 = vcmask 1043459   ;;  %vm292_vm5 = vcmask 1044484   ;;  %vm295_vm6 = vcmask 1045509   ;;  %vm298_vm7 = vcmask 1046534   ;;  %s365_s13 = sshll.u32 %s553_s7, 3 }
   0xd   : > { %vm301_vm8 = vcmask 1047559   ;;  %s119_s16 = scalar_lea.vmem %s549_s1, %s365_s13 }
   0xe   : > { %s428_s12 = scalar_lea.vmem %s548_s0, %s387_s9 }
   0xf   : > { %v431_v0 = vld [vmem:[%s428_s12] sm:$0xff]   ;;  %v122_v1 = vld [vmem:[%s428_s12 + $0x8] sm:$0x1]  ;;  %v435_v2 = vld [vmem:[%s428_s12 + $0xc] sm:$0xff]  }
  0x10   : > { %v370_v3 = vunpack.c.l.bf16 %v431_v0  ;;  %v371_v4 = vunpack.c.h.bf16 %v431_v0  ;;  %v125_v5 = vld [vmem:[%s428_s12 + $0x14] sm:$0x1]  ;;  %v441_v6 = vld [vmem:[%s428_s12 + $0x18] sm:$0xff]   ;;  %v128_v7 = vld [vmem:[%s428_s12 + $0x20] sm:$0x1]  ;;  %v146_v8 = vunpack.c.l.bf16 %v122_v1  ;;  %v147_v9 = vunpack.c.l.bf16 %v435_v2 }
  0x11   : > { %v374_v10 = vunpack.c.l.bf16 %v441_v6  ;;  %v375_v11 = vunpack.c.h.bf16 %v441_v6  ;;  %v448_v12 = vld [vmem:[%s428_s12 + $0x24] sm:$0xff]   ;;  %v131_v13 = vld [vmem:[%s428_s12 + $0x2c] sm:$0x1]  ;;  %v452_v14 = vld [vmem:[%s428_s12 + $0x30] sm:$0xff]   ;;  %v148_v15 = vunpack.c.h.bf16 %v435_v2  ;;  %v149_v16 = vunpack.c.l.bf16 %v125_v5 }
  0x12   : > { %v378_v17 = vunpack.c.l.bf16 %v452_v14  ;;  %v379_v18 = vunpack.c.h.bf16 %v452_v14  ;;  %v134_v19 = vld [vmem:[%s428_s12 + $0x38] sm:$0x1]  ;;  %v459_v20 = vld [vmem:[%s428_s12 + $0x3c] sm:$0xff]   ;;  %v137_v21 = vld [vmem:[%s428_s12 + $0x44] sm:$0x1]  ;;  %v152_v22 = vunpack.c.l.bf16 %v128_v7  ;;  %v153_v23 = vunpack.c.l.bf16 %v448_v12 }
  0x13   : > { %v464_v24 = vld [vmem:[%s428_s12 + $0x48] sm:$0xff]   ;;  %v140_v25 = vld [vmem:[%s428_s12 + $0x50] sm:$0x1]  ;;  %v468_v26 = vld [vmem:[%s428_s12 + $0x54] sm:$0xff]   ;;  %v154_v27 = vunpack.c.h.bf16 %v448_v12  ;;  %v155_v28 = vunpack.c.l.bf16 %v131_v13  ;;  %v158_v29 = vunpack.c.l.bf16 %v134_v19  ;;  %v159_v30 = vunpack.c.l.bf16 %v459_v20 }
  0x14   : > { %v382_v31 = vunpack.c.l.bf16 %v464_v24  ;;  %v383_v32 = vunpack.c.h.bf16 %v464_v24  ;;  %v475_v33 = vld [vmem:[%s428_s12 + $0x5c] sm:$0x1]  ;;  %v160_v34 = vunpack.c.h.bf16 %v459_v20  ;;  %v161_v35 = vunpack.c.l.bf16 %v137_v21 }
  0x15   : > { %v164_v36 = vunpack.c.l.bf16 %v140_v25  ;;  %v165_v37 = vunpack.c.l.bf16 %v468_v26  ;;  %v166_v38 = vunpack.c.h.bf16 %v468_v26  ;;  %v167_v39 = vunpack.c.l.bf16 %v475_v33 }
  0x16   : > { %v169_v40 = vsel %vm168_vm0, %v370_v3, 0.0  ;;  %v170_v41 = vsel %vm168_vm0, %v371_v4, 0.0  ;;  %v173_v42 = vsel %vm172_vm1, %v146_v8, 0.0  ;;  %v181_v43 = vsel %vm168_vm0, %v147_v9, 0.0 }
  0x17   : > { %v171_v44 = vadd.f32 %v170_v41, %v169_v40  ;;  %v182_v45 = vsel %vm168_vm0, %v148_v15, 0.0  ;;  %v184_v46 = vsel %vm172_vm1, %v149_v16, 0.0  ;;  %v192_v47 = vsel %vm168_vm0, %v374_v10, 0.0 }
  0x18   : > { %v183_v48 = vadd.f32 %v182_v45, %v181_v43  ;;  %v193_v49 = vsel %vm168_vm0, %v375_v11, 0.0  ;;  %v195_v50 = vsel %vm172_vm1, %v152_v22, 0.0  ;;  %v203_v51 = vsel %vm168_vm0, %v153_v23, 0.0 }
  0x19   : > { %v174_v52 = vadd.f32 %v173_v42, %v171_v44  ;;  %v194_v53 = vadd.f32 %v193_v49, %v192_v47  ;;  %v204_v54 = vsel %vm168_vm0, %v154_v27, 0.0  ;;  %v206_v55 = vsel %vm172_vm1, %v155_v28, 0.0 }
  0x1a   : > { %v185_v56 = vadd.f32 %v184_v46, %v183_v48  ;;  %v205_v57 = vadd.f32 %v204_v54, %v203_v51  ;;  %v214_v58 = vsel %vm168_vm0, %v378_v17, 0.0  ;;  %v215_v59 = vsel %vm168_vm0, %v379_v18, 0.0 }
  0x1b   : > { %v175_v60 = vrot.slane %v174_v52, 4  ;;  %v196_v61 = vadd.f32 %v195_v50, %v194_v53  ;;  %v216_v62 = vadd.f32 %v215_v59, %v214_v58  ;;  %v217_v63 = vsel %vm172_vm1, %v158_v29, 0.0 }
  0x1c   : > { %v186_v1 = vrot.slane %v185_v56, 4  ;;  %v207_v4 = vadd.f32 %v206_v55, %v205_v57  ;;  %v225_v5 = vsel %vm168_vm0, %v159_v30, 0.0  ;;  %v226_v7 = vsel %vm168_vm0, %v160_v34, 0.0 }
  0x1d   : > { %v176_v8 = vadd.f32 %v175_v60, %v174_v52  ;;  %v197_v11 = vrot.slane %v196_v61, 4  ;;  %v218_v13 = vadd.f32 %v217_v63, %v216_v62  ;;  %v227_v15 = vadd.f32 %v226_v7, %v225_v5 }
  0x1e   : > { %v187_v16 = vadd.f32 %v186_v1, %v185_v56  ;;  %v208_v19 = vrot.slane %v207_v4, 4  ;;  %v228_v18 = vsel %vm172_vm1, %v161_v35, 0.0  ;;  %v236_v21 = vsel %vm168_vm0, %v382_v31, 0.0 }
  0x1f   : > { %v177_v22 = vrot.slane %v176_v8, 2  ;;  %v198_v25 = vadd.f32 %v197_v11, %v196_v61  ;;  %v219_v27 = vrot.slane %v218_v13, 4  ;;  %v229_v28 = vadd.f32 %v228_v18, %v227_v15 }
  0x20   : > { %v188_v29 = vrot.slane %v187_v16, 2  ;;  %v209_v40 = vadd.f32 %v208_v19, %v207_v4  ;;  %v237_v34 = vsel %vm168_vm0, %v383_v32, 0.0  ;;  %v239_v41 = vsel %vm172_vm1, %v164_v36, 0.0 }
  0x21   : > { %v178_v42 = vadd.f32 %v177_v22, %v176_v8  ;;  %v199_v43 = vrot.slane %v198_v25, 2  ;;  %v220_v44 = vadd.f32 %v219_v27, %v218_v13  ;;  %v230_v45 = vrot.slane %v229_v28, 4 }
  0x22   : > { %v189_v46 = vadd.f32 %v188_v29, %v187_v16  ;;  %v210_v35 = vrot.slane %v209_v40, 2  ;;  %v238_v47 = vadd.f32 %v237_v34, %v236_v21  ;;  %v247_v48 = vsel %vm168_vm0, %v165_v37, 0.0 }
  0x23   : > { %v179_v49 = vrot.slane %v178_v42, 1  ;;  %v200_v50 = vadd.f32 %v199_v43, %v198_v25  ;;  %v221_v51 = vrot.slane %v220_v44, 2  ;;  %v231_v52 = vadd.f32 %v230_v45, %v229_v28 }
  0x24   : > { %v190_v53 = vrot.slane %v189_v46, 1  ;;  %v211_v54 = vadd.f32 %v210_v35, %v209_v40  ;;  %v240_v32 = vadd.f32 %v239_v41, %v238_v47  ;;  %v248_v36 = vsel %vm168_vm0, %v166_v38, 0.0 }
  0x25   : > { %v180_v55 = vadd.f32 %v179_v49, %v178_v42  ;;  %v201_v56 = vrot.slane %v200_v50, 1  ;;  %v222_v57 = vadd.f32 %v221_v51, %v220_v44  ;;  %v232_v58 = vrot.slane %v231_v52, 2 }
  0x26   : > { %v191_v59 = vadd.f32 %v190_v53, %v189_v46  ;;  %v212_v60 = vrot.slane %v211_v54, 1  ;;  %v241_v61 = vrot.slane %v240_v32, 4  ;;  %v249_v62 = vadd.f32 %v248_v36, %v247_v48 }
  0x27   : > { %v202_v63 = vadd.f32 %v201_v56, %v200_v50  ;;  %v223_v1 = vrot.slane %v222_v57, 1  ;;  %v233_v4 = vadd.f32 %v232_v58, %v231_v52  ;;  %v250_v5 = vsel %vm172_vm1, %v167_v39, 0.0 }
  0x28   : > { %v213_v7 = vadd.f32 %v212_v60, %v211_v54  ;;  %v242_v8 = vadd.f32 %v241_v61, %v240_v32  ;;  %v251_v11 = vadd.f32 %v250_v5, %v249_v62  ;;  %v258_v38 = vsub.f32 %v180_v55, %v370_v3 }
  0x29   : > { %v224_v13 = vadd.f32 %v223_v1, %v222_v57  ;;  %v234_v15 = vrot.slane %v233_v4, 1  ;;  %v259_v16 = vsub.f32 %v191_v59, %v147_v9  ;;  %v260_v19 = vsub.f32 %v202_v63, %v374_v10 }
  0x2a   : > { %v243_v18 = vrot.slane %v242_v8, 2  ;;  %v252_v21 = vrot.slane %v251_v11, 4  ;;  %v261_v33 = vsub.f32 %v213_v7, %v153_v23  ;;  %v266_v39 = vmul.f32 0.0625, %v258_v38 }
  0x2b   : > { %v235_v22 = vadd.f32 %v234_v15, %v233_v4  ;;  %v262_v0 = vsub.f32 %v224_v13, %v378_v17  ;;  %v267_v3 = vmul.f32 0.0625, %v259_v16  ;;  %v268_v25 = vmul.f32 0.0625, %v260_v19 }
  0x2c   : > { %v244_v27 = vadd.f32 %v243_v18, %v242_v8  ;;  %v253_v28 = vadd.f32 %v252_v21, %v251_v11  ;;  %v269_v2 = vmul.f32 0.0625, %v261_v33 }
  0x2d   : > { %v263_v6 = vsub.f32 %v235_v22, %v159_v30  ;;  %v270_v9 = vmul.f32 0.0625, %v262_v0  ;;  %v282_v10 = vrot.slane %v267_v3, 7  ;;  %v285_v29 = vrot.slane %v268_v25, 6 }
  0x2e   : > { %v245_v12 = vrot.slane %v244_v27, 1  ;;  %v254_v23 = vrot.slane %v253_v28, 2  ;;  %v288_v40 = vrot.slane %v269_v2, 5 }
  0x2f   : > { %v271_v14 = vmul.f32 0.0625, %v263_v6  ;;  %v284_v17 = vsel %vm283_vm2, %v282_v10, %v266_v39  ;;  %v291_v34 = vrot.slane %v270_v9, 4 }
  0x30   : > { %v246_v41 = vadd.f32 %v245_v12, %v244_v27  ;;  %v255_v42 = vadd.f32 %v254_v23, %v253_v28  ;;  %v287_v43 = vsel %vm286_vm3, %v285_v29, %v284_v17 }
  0x31   : > { %v290_v44 = vsel %vm289_vm4, %v288_v40, %v287_v43  ;;  %v294_v45 = vrot.slane %v271_v14, 3 }
  0x32   : > { %v256_v20 = vrot.slane %v255_v42, 1  ;;  %v264_v30 = vsub.f32 %v246_v41, %v382_v31  ;;  %v293_v46 = vsel %vm292_vm5, %v291_v34, %v290_v44 }
  0x33   : > { %v296_v49 = vsel %vm295_vm6, %v294_v45, %v293_v46 }
  0x34   : > { %v257_v35 = vadd.f32 %v256_v20, %v255_v42  ;;  %v272_v47 = vmul.f32 0.0625, %v264_v30 }
  0x36   : > { %v265_v48 = vsub.f32 %v257_v35, %v165_v37  ;;  %v297_v50 = vrot.slane %v272_v47, 2 }
  0x38   : > { %v273_v51 = vmul.f32 0.0625, %v265_v48  ;;  %v299_v52 = vsel %vm298_vm7, %v297_v50, %v296_v49 }
  0x3a   : > { %v300_v24 = vrot.slane %v273_v51, 1 }
  0x3c   : > { %v302_v31 = vsel %vm301_vm8, %v300_v24, %v299_v52 }
  0x3d   : > { %304 = vst.msk [vmem:[%s119_s16] sm:$0xff] %vm168_vm0, %v302_v31 }
  0x3e PF: > { %s11_s6 = sadd.s32 1, %s402_s6  }
  0x3f   : > { %p8_p5 = scmp.ge.s32.totalorder %s11_s6, 4  }
  0x41   :  { %10 = sbr.rel (!%p8_p5) target bundleno = 1 (0x1), region = 54 }

// kernel: linear_probe_head.3
= control target key start
LH: loop header
LB: loop body
LE: loop exit
PB: predicated region body
PF: predicated region fallthrough
CT: control target
= control target key end

     0   :  { %vm56_vm0 = vcmask 261120   ;;  %s151_s3 = inlined_call_operand.vmem [shape: bf16[32,128], index: 3, kind: input, shape index: {}]   ;;  %s152_s0 = inlined_call_operand.vmem [shape: f32[16,32], index: 0, kind: input, shape index: {}]   ;;  %s153_s1 = inlined_call_operand.vmem [shape: f32[1,32], index: 1, kind: input, shape index: {}]   ;;  %s154_s2 = inlined_call_operand.vmem [shape: f32[1,32], index: 2, kind: input, shape index: {}]   ;;  %s155_s4 = inlined_call_operand.vmem [shape: f32[1,128], index: 4, kind: input, shape index: {}]   ;;  %s156_s5 = inlined_call_operand.vmem [shape: f32[16,128], index: 5, kind: output, shape index: {}]  }
   0x1   :  { %v90_v0 = vld [vmem:[%s151_s3 + $0x8] sm:$0xff]  ;;  %v89_v1 = vld [vmem:[%s151_s3] sm:$0xff] }
   0x2   :  { %v21_v2 = vld [vmem:[%s152_s0] sm:$0xff]  ;;  %v22_v3 = vld [vmem:[%s152_s0 + $0x8] sm:$0xff]  ;;  %66 = vmatpush.bf16.msra.mxu0 %v90_v0 }
   0x3   :  { %v91_v4 = vld [vmem:[%s153_s1] ss:$0 sm:$0xff] }
   0x4   :  { %v92_v5 = vld [vmem:[%s154_s2] ss:$0 sm:$0xff]  ;;  %v27_v6 = vsub.f32 %v21_v2, %v91_v4  ;;  %v28_v7 = vsub.f32 %v22_v3, %v91_v4 }
   0x5   :  { %v93_v11 = vld [vmem:[%s155_s4] ss:$0 sm:$0xff] }
   0x6   :  { %v33_v8 = vmul.f32 %v92_v5, %v27_v6  ;;  %v34_v9 = vmul.f32 %v92_v5, %v28_v7  ;;  %67 = vmatpush.bf16.msra.mxu0 %v89_v1 }
   0x8   :  { %v35_v10 = vpack.c.bf16 %v34_v9, %v33_v8 }
   0xa   :  { %88 = vmatmul.msk.bf16.vlgmr.msra.gmra.mxu0 %vm56_vm0, %v35_v10 }
  0x87   :  { %v69_v12 = vpop.f32.mrf.mxu0 }
  0x88   :  { %v70_v13 = vadd.f32 %v93_v11, %v69_v12 }
  0x8a   :  { %74 = vst [vmem:[%s156_s5] sm:$0xff] %v70_v13 }
  0x8f   :  { %v71_v14 = vpop.f32.mrf.mxu0 }
  0x90   :  { %v72_v15 = vadd.f32 %v93_v11, %v71_v14 }
  0x92   :  { %75 = vst [vmem:[%s156_s5 + $0x8] sm:$0xff] %v72_v15 }

</bundles_post_ra>
